<compile_context>
chip_gen: v7x
topology: tpu7x:2x2x1
jax: 0.10.0
libtpu: 0.0.40
codegen_flags: <defaults>
</compile_context>

<pallas_src>
from functools import partial

import jax
import jax.numpy as jnp
from jax.experimental import pallas as pl
from jax.experimental.pallas import tpu as pltpu


# ---------------------------------------------------------------------------
# Small helpers
# ---------------------------------------------------------------------------

def _round_up(x, m):
    return (x + m - 1) // m * m


def _pad2(x, d0, d1):
    p0, p1 = d0 - x.shape[0], d1 - x.shape[1]
    if p0 or p1:
        x = jnp.pad(x, ((0, p0), (0, p1)))
    return x


def _pick_tk(k_pad):
    # Largest K-block (multiple of 128, <= 1024) that evenly divides the padded K.
    best, cand = 128, 128
    lim = min(k_pad, 1024)
    while cand <= lim:
        if k_pad % cand == 0:
            best = cand
        cand += 128
    return best


# ---------------------------------------------------------------------------
# Pallas kernels
# ---------------------------------------------------------------------------

def _gemm_bn_kernel(a_ref, w_ref, s_ref, t_ref, o_ref, acc_ref, *, relu):
    """K-tiled bf16 GEMM, f32 accumulator; fused BN scale/shift + optional ReLU epilogue."""
    k = pl.program_id(2)

    @pl.when(k == 0)
    def _():
        acc_ref[...] = jnp.zeros_like(acc_ref)

    acc_ref[...] += jnp.dot(a_ref[...], w_ref[...],
                            preferred_element_type=jnp.float32)

    @pl.when(k == pl.num_programs(2) - 1)
    def _():
        y = acc_ref[...] * s_ref[...] + t_ref[...]
        if relu:
            y = jnp.maximum(y, 0.0)
        o_ref[...] = y.astype(o_ref.dtype)


def _gemm_bn_res_kernel(a_ref, w_ref, s_ref, t_ref, r_ref, o_ref, acc_ref, *, relu):
    """Same as _gemm_bn_kernel plus a fused residual add in the epilogue."""
    k = pl.program_id(2)

    @pl.when(k == 0)
    def _():
        acc_ref[...] = jnp.zeros_like(acc_ref)

    acc_ref[...] += jnp.dot(a_ref[...], w_ref[...],
                            preferred_element_type=jnp.float32)

    @pl.when(k == pl.num_programs(2) - 1)
    def _():
        y = acc_ref[...] * s_ref[...] + t_ref[...] + r_ref[...].astype(jnp.float32)
        if relu:
            y = jnp.maximum(y, 0.0)
        o_ref[...] = y.astype(o_ref.dtype)


def _maxpool_kernel(p_ref, o_ref):
    # p: (9, tm, C) stacked 3x3 window taps -> elementwise max over taps.
    o_ref[...] = jnp.max(p_ref[...], axis=0)


def _avgpool_kernel(x_ref, o_ref):
    # x: (N, H*W, tc) -> f32 mean over spatial.
    o_ref[...] = jnp.mean(x_ref[...].astype(jnp.float32), axis=1)


# Module-level kernel partial cache: identical call sites -> identical jaxpr params.
_GEMM_KERNELS = {
    (False, False): partial(_gemm_bn_kernel, relu=False),
    (False, True): partial(_gemm_bn_kernel, relu=True),
    (True, False): partial(_gemm_bn_res_kernel, relu=False),
    (True, True): partial(_gemm_bn_res_kernel, relu=True),
}


# ---------------------------------------------------------------------------
# Fused conv (im2col GEMM) + BN + residual + ReLU wrapper
# ---------------------------------------------------------------------------

def fused_gemm_bn(a, w, s, t, r=None, *, relu):
    """out = maybe_relu((a @ w) * s + t [+ r]).

    a:(M,K) bf16 patches, w:(K,N) bf16 weights, s,t:(1,N) f32 folded BN,
    r:(M,N) bf16 residual or None.  Returns (M,N) bf16.
    """
    M, K = a.shape
    N = w.shape[1]

    tm = 256 if (M >= 256 and M % 256 == 0) else 128
    tn = 256 if (N >= 256 and N % 256 == 0) else 128
    m_pad = _round_up(M, tm)
    n_pad = _round_up(N, tn)
    k_pad = _round_up(K, 128)
    tk = _pick_tk(k_pad)

    a_p = _pad2(a.astype(jnp.bfloat16), m_pad, k_pad)
    w_p = _pad2(w.astype(jnp.bfloat16), k_pad, n_pad)
    s_p = _pad2(s.astype(jnp.float32), 1, n_pad)
    t_p = _pad2(t.astype(jnp.float32), 1, n_pad)

    grid = (m_pad // tm, n_pad // tn, k_pad // tk)

    a_spec = pl.BlockSpec((tm, tk), lambda i, j, k: (i, k))
    w_spec = pl.BlockSpec((tk, tn), lambda i, j, k: (k, j))
    v_spec = pl.BlockSpec((1, tn), lambda i, j, k: (0, j))
    o_spec = pl.BlockSpec((tm, tn), lambda i, j, k: (i, j))

    has_res = r is not None
    kernel = _GEMM_KERNELS[(has_res, bool(relu))]
    if has_res:
        r_p = _pad2(r.astype(jnp.bfloat16), m_pad, n_pad)
        in_specs = [a_spec, w_spec, v_spec, v_spec, o_spec]
        args = (a_p, w_p, s_p, t_p, r_p)
    else:
        in_specs = [a_spec, w_spec, v_spec, v_spec]
        args = (a_p, w_p, s_p, t_p)

    out = pl.pallas_call(
        kernel,
        out_shape=jax.ShapeDtypeStruct((m_pad, n_pad), jnp.bfloat16),
        grid=grid,
        in_specs=in_specs,
        out_specs=o_spec,
        scratch_shapes=[pltpu.VMEM((tm, tn), jnp.float32)],
        compiler_params=pltpu.CompilerParams(
            dimension_semantics=("parallel", "parallel", "arbitrary"),
            vmem_limit_bytes=48 * 1024 * 1024),
    )(*args)
    return out[:M, :N]


# ---------------------------------------------------------------------------
# Glue: im2col, pooling wrappers, conv+bn wrapper
# ---------------------------------------------------------------------------

def im2col(x, kh, kw, stride, pad):
    """x: (N,H,W,C) NHWC bf16 -> patches (N*Ho*Wo, kh*kw*C) with (kh,kw,C) minor ordering."""
    if pad > 0:
        x = jnp.pad(x, ((0, 0), (pad, pad), (pad, pad), (0, 0)))
    n, hp, wp, c = x.shape
    ho = (hp - kh) // stride + 1
    wo = (wp - kw) // stride + 1
    cols = []
    for i in range(kh):
        for j in range(kw):
            cols.append(x[:, i:i + stride * ho:stride, j:j + stride * wo:stride, :])
    patches = jnp.concatenate(cols, axis=-1)  # (N, Ho, Wo, kh*kw*C)
    return patches.reshape(n * ho * wo, kh * kw * c), (n, ho, wo)


def conv_bn_act(x, w, kh, kw, stride, pad, bn, residual=None, relu=True, use_pallas=True):
    patches, (n, ho, wo) = im2col(x, kh, kw, stride, pad)
    cout = w.shape[1]
    s, t = bn
    r = None if residual is None else residual.reshape(n * ho * wo, cout)
    if use_pallas:
        y = fused_gemm_bn(patches, w, s, t, r, relu=relu)
    else:  # pure-JAX reference of the same (bf16-in, f32-acc) math
        acc = jnp.dot(patches.astype(jnp.bfloat16), w.astype(jnp.bfloat16),
                      preferred_element_type=jnp.float32)
        y = acc * s + t
        if r is not None:
            y = y + r.astype(jnp.float32)
        if relu:
            y = jnp.maximum(y, 0.0)
        y = y.astype(jnp.bfloat16)
    return y.reshape(n, ho, wo, cout)


def maxpool_3x3_s2_p1(x, use_pallas=True):
    # TODO(synk): the 9-tap stack is still materialized (bf16, tiled); a strided direct
    # pooling kernel is not expressible with rectangular BlockSpecs.
    n, h, w, c = x.shape
    ho = (h + 2 - 3) // 2 + 1
    wo = (w + 2 - 3) // 2 + 1
    xp = jnp.pad(x, ((0, 0), (1, 1), (1, 1), (0, 0)), constant_values=-jnp.inf)
    taps = [xp[:, i:i + 2 * ho:2, j:j + 2 * wo:2, :].reshape(n * ho * wo, c)
            for i in range(3) for j in range(3)]
    p = jnp.stack(taps, axis=0)  # (9, M, C)
    m = n * ho * wo
    if use_pallas:
        if m % 512 == 0:
            tm, m_pad = 512, m
        elif m % 256 == 0:
            tm, m_pad = 256, m
        elif m % 128 == 0:
            tm, m_pad = 128, m
        else:
            tm, m_pad = 128, _round_up(m, 128)
            p = jnp.pad(p, ((0, 0), (0, m_pad - m), (0, 0)))
        y = pl.pallas_call(
            _maxpool_kernel,
            out_shape=jax.ShapeDtypeStruct((m_pad, c), x.dtype),
            grid=(m_pad // tm,),
            in_specs=[pl.BlockSpec((9, tm, c), lambda i: (0, i, 0))],
            out_specs=pl.BlockSpec((tm, c), lambda i: (i, 0)),
            compiler_params=pltpu.CompilerParams(dimension_semantics=("parallel",)),
        )(p)
        y = y[:m]
    else:
        y = jnp.max(p, axis=0)
    return y.reshape(n, ho, wo, c)


def global_avgpool(x, use_pallas=True):
    n, h, w, c = x.shape
    xr = x.reshape(n, h * w, c)
    if use_pallas:
        tc = 256 if c % 256 == 0 else c
        return pl.pallas_call(
            _avgpool_kernel,
            out_shape=jax.ShapeDtypeStruct((n, c), jnp.float32),
            grid=(c // tc,),
            in_specs=[pl.BlockSpec((n, h * w, tc), lambda j: (0, 0, j))],
            out_specs=pl.BlockSpec((n, tc), lambda j: (0, j)),
            compiler_params=pltpu.CompilerParams(dimension_semantics=("parallel",)),
        )(xr)
    return jnp.mean(xr.astype(jnp.float32), axis=1)


# ---------------------------------------------------------------------------
# ResNet-50 parameters (deterministic synthetic init) and forward pass
# ---------------------------------------------------------------------------

class KeyGen:
    def __init__(self, key):
        self._key = key

    def __call__(self):
        self._key, sub = jax.random.split(self._key)
        return sub


def init_conv(kg, kh, kw, cin, cout):
    # weight already in GEMM layout (kh*kw*cin, cout), matching im2col ordering; bf16.
    fan_in = kh * kw * cin
    w = jax.random.normal(kg(), (fan_in, cout), jnp.float32) * (1.0 / fan_in) ** 0.5
    return w.astype(jnp.bfloat16)


def make_bn(kg, c, eps=1e-5):
    gamma = 1.0 + 0.1 * jax.random.normal(kg(), (c,), jnp.float32)
    beta = 0.1 * jax.random.normal(kg(), (c,), jnp.float32)
    mean = 0.05 * jax.random.normal(kg(), (c,), jnp.float32)
    var = jax.random.uniform(kg(), (c,), jnp.float32, minval=0.8, maxval=1.2)
    s = gamma / jnp.sqrt(var + eps)
    t = beta - mean * s
    return s.reshape(1, c), t.reshape(1, c)


def make_bottleneck_params(kg, cin, planes, stride):
    cout = planes * 4
    p = {
        "w1": init_conv(kg, 1, 1, cin, planes), "bn1": make_bn(kg, planes),
        "w2": init_conv(kg, 3, 3, planes, planes), "bn2": make_bn(kg, planes),
        "w3": init_conv(kg, 1, 1, planes, cout), "bn3": make_bn(kg, cout),
    }
    if stride != 1 or cin != cout:
        p["wd"] = init_conv(kg, 1, 1, cin, cout)
        p["bnd"] = make_bn(kg, cout)
    return p


def make_resnet50_params(key):
    kg = KeyGen(key)
    params = {
        "stem_w": init_conv(kg, 7, 7, 3, 64),
        "stem_bn": make_bn(kg, 64),
        "layers": [],
    }
    cin = 64
    for planes, nblocks, _stride in [(64, 3, 1), (128, 4, 2), (256, 6, 2), (512, 3, 2)]:
        blocks = []
        for b in range(nblocks):
            s = _stride if b == 0 else 1
            blocks.append(make_bottleneck_params(kg, cin, planes, s))
            cin = planes * 4
        params["layers"].append(blocks)
    return params


def bottleneck_forward(x, p, stride, use_pallas):
    if "wd" in p:
        identity = conv_bn_act(x, p["wd"], 1, 1, stride, 0, p["bnd"],
                               relu=False, use_pallas=use_pallas)
    else:
        identity = x
    y = conv_bn_act(x, p["w1"], 1, 1, 1, 0, p["bn1"], relu=True, use_pallas=use_pallas)
    y = conv_bn_act(y, p["w2"], 3, 3, stride, 1, p["bn2"], relu=True, use_pallas=use_pallas)
    y = conv_bn_act(y, p["w3"], 1, 1, 1, 0, p["bn3"],
                    residual=identity, relu=True, use_pallas=use_pallas)
    return y


def image_encoder_forward(params, x_nchw, use_pallas=True):
    """ImageEncoder.forward: ResNet-50 with fc=Identity. Input NCHW, output (N, 2048) f32."""
    x = jnp.transpose(x_nchw, (0, 2, 3, 1)).astype(jnp.bfloat16)  # NCHW -> NHWC, bf16
    x = conv_bn_act(x, params["stem_w"], 7, 7, 2, 3, params["stem_bn"],
                    relu=True, use_pallas=use_pallas)
    x = maxpool_3x3_s2_p1(x, use_pallas)
    stage_strides = [1, 2, 2, 2]
    for li, blocks in enumerate(params["layers"]):
        for bi, bp in enumerate(blocks):
            s = stage_strides[li] if bi == 0 else 1
            x = bottleneck_forward(x, bp, s, use_pallas)
    return global_avgpool(x, use_pallas)  # (N, 2048) f32; fc == Identity


# ---------------------------------------------------------------------------
# Lightweight per-kernel correctness checks (cheap compiles, no second full-net compile)
# ---------------------------------------------------------------------------

def _assert_close(got, ref, name, tol=2e-2):
    got = jnp.asarray(got, jnp.float32)
    ref = jnp.asarray(ref, jnp.float32)
    rel = float(jnp.max(jnp.abs(got - ref)) / (jnp.max(jnp.abs(ref)) + 1e-6))
    assert rel < tol, f"{name}: Pallas vs reference mismatch, rel err = {rel}"


def _unit_checks(key):
    ka, kw, ks, kb, kr, kx, ky = jax.random.split(key, 7)

    # Fused GEMM + BN (+ residual + ReLU) vs plain jnp math.
    a = (0.5 * jax.random.normal(ka, (200, 147), jnp.float32)).astype(jnp.bfloat16)
    w = (0.1 * jax.random.normal(kw, (147, 64), jnp.float32)).astype(jnp.bfloat16)
    s = 1.0 + 0.1 * jax.random.normal(ks, (1, 64), jnp.float32)
    t = 0.1 * jax.random.normal(kb, (1, 64), jnp.float32)
    r = (0.5 * jax.random.normal(kr, (200, 64), jnp.float32)).astype(jnp.bfloat16)

    ref = jnp.dot(a, w, preferred_element_type=jnp.float32) * s + t
    _assert_close(fused_gemm_bn(a, w, s, t, relu=False), ref, "gemm_bn")
    ref_r = jnp.maximum(ref + r.astype(jnp.float32), 0.0)
    _assert_close(fused_gemm_bn(a, w, s, t, r, relu=True), ref_r, "gemm_bn_res_relu")

    # Pooling kernels vs pure-JAX path.
    x = jax.random.normal(kx, (2, 16, 16, 64), jnp.float32).astype(jnp.bfloat16)
    _assert_close(maxpool_3x3_s2_p1(x, True), maxpool_3x3_s2_p1(x, False), "maxpool")
    y = jax.random.normal(ky, (2, 2, 2, 2048), jnp.float32).astype(jnp.bfloat16)
    _assert_close(global_avgpool(y, True), global_avgpool(y, False), "avgpool")


# ---------------------------------------------------------------------------
# Main
# ---------------------------------------------------------------------------

if __name__ == "__main__":
    key = jax.random.PRNGKey(0)
    pkey, xkey, ukey = jax.random.split(key, 3)

    # Per-kernel correctness checks (tiny shapes, fast compiles).
    _unit_checks(ukey)

    # Small input consistent with the module: NCHW, 3 channels (ResNet-50 stem).
    params = jax.jit(make_resnet50_params)(pkey)
    x = jax.random.normal(xkey, (2, 3, 64, 64), jnp.float32)

    fwd = jax.jit(image_encoder_forward)
    feats = jax.block_until_ready(fwd(params, x))

    assert feats.shape == (2, 2048), feats.shape
    assert feats.dtype == jnp.float32, feats.dtype
    assert bool(jnp.all(jnp.isfinite(feats))), "non-finite features"

    print("KERNEL_OK")
</pallas_src>

<mosaic_0001>
module attributes {stable_mosaic.version = 11 : i64} {
  func.func @_gemm_bn_kernel(%arg0: i32, %arg1: i32, %arg2: i32, %arg3: memref<128x256xbf16, #tpu.memory_space<vmem>>, %arg4: memref<256x128xbf16, #tpu.memory_space<vmem>>, %arg5: memref<1x128xf32, #tpu.memory_space<vmem>>, %arg6: memref<1x128xf32, #tpu.memory_space<vmem>>, %arg7: memref<128x128xbf16, #tpu.memory_space<vmem>>, %arg8: memref<128x128xf32, #tpu.memory_space<vmem>>) attributes {dimension_semantics = [#tpu.dimension_semantics<parallel>, #tpu.dimension_semantics<parallel>, #tpu.dimension_semantics<arbitrary>], iteration_bounds = array<i64: 2, 1, 1>, scalar_prefetch = 0 : i64, scratch_operands = 1 : i64, tpu.core_type = #tpu.core_type<tc>, window_params = [{transform_indices = @transform_0, window_bounds = array<i64: 128, 256>}, {transform_indices = @transform_1, window_bounds = array<i64: 256, 128>}, {transform_indices = @transform_2, window_bounds = array<i64: 1, 128>}, {transform_indices = @transform_3, window_bounds = array<i64: 1, 128>}, {transform_indices = @transform_4, window_bounds = array<i64: 128, 128>}]} {
    %c0_i32 = arith.constant 0 : i32
    %0 = arith.cmpi eq, %arg2, %c0_i32 : i32
    %1 = arith.extui %0 : i1 to i32
    %c0_i32_0 = arith.constant 0 : i32
    %2 = arith.cmpi ne, %1, %c0_i32_0 : i32
    scf.if %2 {
      %cst_10 = arith.constant 0.000000e+00 : f32
      %12 = vector.broadcast %cst_10 : f32 to vector<128x128xf32>
      %c0_11 = arith.constant 0 : index
      %c0_12 = arith.constant 0 : index
      %13 = vector.load %arg8[%c0_11, %c0_12] : memref<128x128xf32, #tpu.memory_space<vmem>>, vector<128x128xf32>
      tpu.vector_store %arg8[%c0_11, %c0_12], %12 {strides = array<i32>} : memref<128x128xf32, #tpu.memory_space<vmem>>, vector<128x128xf32>,
    } else {
    }
    %c0 = arith.constant 0 : index
    %c0_1 = arith.constant 0 : index
    %3 = vector.load %arg8[%c0, %c0_1] : memref<128x128xf32, #tpu.memory_space<vmem>>, vector<128x128xf32>
    %c0_2 = arith.constant 0 : index
    %c0_3 = arith.constant 0 : index
    %4 = vector.load %arg3[%c0_2, %c0_3] : memref<128x256xbf16, #tpu.memory_space<vmem>>, vector<128x256xbf16>
    %c0_4 = arith.constant 0 : index
    %c0_5 = arith.constant 0 : index
    %5 = vector.load %arg4[%c0_4, %c0_5] : memref<256x128xbf16, #tpu.memory_space<vmem>>, vector<256x128xbf16>
    %cst = arith.constant dense<0.000000e+00> : vector<128x128xf32>
    %6 = tpu.matmul %4, %5, %cst {dimension_numbers = #tpu.dot_dimension_numbers<[1], [0], [0], [1], [0, 0, 1, 1], [], []>} : vector<128x256xbf16>, vector<256x128xbf16>, vector<128x128xf32> -> vector<128x128xf32>
    %7 = arith.addf %3, %6 : vector<128x128xf32>
    %c0_6 = arith.constant 0 : index
    %c0_7 = arith.constant 0 : index
    %8 = vector.load %arg8[%c0_6, %c0_7] : memref<128x128xf32, #tpu.memory_space<vmem>>, vector<128x128xf32>
    tpu.vector_store %arg8[%c0_6, %c0_7], %7 {strides = array<i32>} : memref<128x128xf32, #tpu.memory_space<vmem>>, vector<128x128xf32>,
    %c0_i32_8 = arith.constant 0 : i32
    %9 = arith.cmpi eq, %arg2, %c0_i32_8 : i32
    %10 = arith.extui %9 : i1 to i32
    %c0_i32_9 = arith.constant 0 : i32
    %11 = arith.cmpi ne, %10, %c0_i32_9 : i32
    scf.if %11 {
      %c0_10 = arith.constant 0 : index
      %c0_11 = arith.constant 0 : index
      %12 = vector.load %arg8[%c0_10, %c0_11] : memref<128x128xf32, #tpu.memory_space<vmem>>, vector<128x128xf32>
      %c0_12 = arith.constant 0 : index
      %c0_13 = arith.constant 0 : index
      %13 = vector.load %arg5[%c0_12, %c0_13] : memref<1x128xf32, #tpu.memory_space<vmem>>, vector<1x128xf32>
      %14 = vector.broadcast %13 : vector<1x128xf32> to vector<128x128xf32>
      %15 = arith.mulf %12, %14 : vector<128x128xf32>
      %c0_14 = arith.constant 0 : index
      %c0_15 = arith.constant 0 : index
      %16 = vector.load %arg6[%c0_14, %c0_15] : memref<1x128xf32, #tpu.memory_space<vmem>>, vector<1x128xf32>
      %17 = vector.broadcast %16 : vector<1x128xf32> to vector<128x128xf32>
      %18 = arith.addf %15, %17 : vector<128x128xf32>
      %19 = arith.truncf %18 : vector<128x128xf32> to vector<128x128xbf16>
      %c0_16 = arith.constant 0 : index
      %c0_17 = arith.constant 0 : index
      %20 = vector.load %arg7[%c0_16, %c0_17] : memref<128x128xbf16, #tpu.memory_space<vmem>>, vector<128x128xbf16>
      tpu.vector_store %arg7[%c0_16, %c0_17], %19 {strides = array<i32>} : memref<128x128xbf16, #tpu.memory_space<vmem>>, vector<128x128xbf16>,
    } else {
    }
    return
  }
  func.func @transform_0(%arg0: i32, %arg1: i32, %arg2: i32) -> (i32, i32) {
    %c0_i32 = arith.constant 0 : i32
    return %arg0, %arg2 : i32, i32
  }
  func.func @transform_1(%arg0: i32, %arg1: i32, %arg2: i32) -> (i32, i32) {
    %c0_i32 = arith.constant 0 : i32
    return %arg2, %arg1 : i32, i32
  }
  func.func @transform_2(%arg0: i32, %arg1: i32, %arg2: i32) -> (i32, i32) {
    %c0_i32 = arith.constant 0 : i32
    %c0_i32_0 = arith.constant 0 : i32
    return %c0_i32, %arg1 : i32, i32
  }
  func.func @transform_3(%arg0: i32, %arg1: i32, %arg2: i32) -> (i32, i32) {
    %c0_i32 = arith.constant 0 : i32
    %c0_i32_0 = arith.constant 0 : i32
    return %c0_i32, %arg1 : i32, i32
  }
  func.func @transform_4(%arg0: i32, %arg1: i32, %arg2: i32) -> (i32, i32) {
    %c0_i32 = arith.constant 0 : i32
    return %arg0, %arg1 : i32, i32
  }
}

</mosaic_0001>

<bundles_post_ra>
// kernel: tpu_custom_call.1
= control target key start
LH: loop header
LB: loop body
LE: loop exit
PB: predicated region body
PF: predicated region fallthrough
CT: control target
= control target key end

     0   :  { %9 = vsyncpa [#allocation4], 0  ;;  %s1783_s0 = inlined_call_operand.hbm [shape: bf16[256,256], index: 0, kind: input, shape index: {}]   ;;  %s1784_s1 = inlined_call_operand.hbm [shape: bf16[256,128], index: 1, kind: input, shape index: {}]   ;;  %s1785_s2 = inlined_call_operand.vmem [shape: f32[1,128], index: 2, kind: input, shape index: {}]   ;;  %s1786_s3 = inlined_call_operand.vmem [shape: f32[1,128], index: 3, kind: input, shape index: {}]   ;;  %s1787_s4 = inlined_call_operand.hbm [shape: bf16[256,128], index: 4, kind: output, shape index: {}]  }
   0x1   :  { %11 = vsyncpa [#allocation4 + $0x1], 0 }
   0x2   :  { %12 = vsyncpa [#allocation7], 0 }
   0x3   :  { %13 = vsyncpa [#allocation5], 0 }
   0x4   :  { %15 = vsyncpa [#allocation5 + $0x1], 0  ;;  %s1492_s15 = smov 0   ;;  %s1494_s16 = smov 0  }
   0x5   :  { %s1496_s17 = smov 0   ;;  %s1498_s18 = smov 0  }
   0x6   :  { %s1500_s19 = smov 0   ;;  %s1502_s20 = smov 0  }
   0x7 LB: > { %s977_s21 = sadd.s32 4294967295, %s1456_s20   ;;  %s978_s22 = sadd.s32 4294967294, %s1456_s20   ;;  %s1456_s20 = sphi %s1502_s20, %s21_s20   ;;  %s1452_s19 = sphi %s1500_s19, %s1811_s19   ;;  %s1448_s18 = sphi %s1498_s18, %s1810_s18   ;;  %s1444_s17 = sphi %s1496_s17, %s1809_s17   ;;  %s1440_s16 = sphi %s1494_s16, %s1808_s16   ;;  %s1436_s15 = sphi %s1492_s15, %s1807_s15  }
   0x8   : > { %p62_p0 = scmp.ne.s32.totalorder %s1440_s16, %s1436_s15  ;;  %p1526_p1 = scmp.eq.s32.totalorder %s977_s21, 0 }
   0x9   : > { %p1530_p2 = scmp.eq.s32.totalorder %s977_s21, 1  ;;  %p174_p3 = scmp.eq.s32.totalorder %s978_s22, 1 }
   0xa   : > { %s1792_s23 = scalar_select %p1526_p1, 1, 0 }
   0xb   : > { %s1793_s24 = scalar_select %p1530_p2, 1, 0 }
   0xc   : > { %p1536_p4 = por %p1526_p1, %p62_p0  ;;  %p979_p5 = scmp.ge.s32.totalorder %s1456_s20, 1 }
   0xd   : > { %p1541_p6 = por %p174_p3, %p62_p0  ;;  %p181_p7 = scmp.lt.s32.totalorder %s1456_s20, 3 }
   0xe   : > { %s1794_s25 = scalar_select %p1536_p4, 1, 0 }
   0xf   : > { %s1795_s26 = scalar_select %p1541_p6, 1, 0 }
  0x10   : > { %p1546_p8 = pnand %p979_p5, %p181_p7  ;;  %s1458_s28 = smov [#allocation6]  }
  0x11   : > { %s197_s29 = sshll.u32 %s1458_s28, 4  ;;  %s40_s5 = sadd.s32 1, %s1452_s19  ;;  %s198_s29 = int_to_ptr.vmem [resolvable:$true] %s197_s29 }
  0x12   : > { %s1796_s27 = scalar_select %p1546_p8, 1, 0 }
  0x13   : > { %p1201_p9 = pneg %p1546_p8  ;;  %s1312_s8 = scalar_lea.hbm %s1784_s1, 2048 }
  0x14   : > { %p1313_p12 = scmp.ne.s32.totalorder %s1784_s1, %s1312_s8  ;;  %p1319_p5 = scmp.lt.u32.totalorder %s1312_s8, %s1784_s1 }
  0x15   : > { %p1555_p11 = pnand %p1201_p9, %p1526_p1 }
  0x17   : > { %p1314_p13 = pneg %p1555_p11 }
  0x19   : > { %p1315_p0 = pnand %p1314_p13, %p1313_p12 }
  0x1b   : > { %p1316_p3 = pneg %p1315_p0 }
  0x1d   : > { %p1321_p7 = pnand %p1319_p5, %p1316_p3 }
  0x1f   : > { %1324 = shalt.err (!%p1321_p7)
}
  0x20   : > { %s1325_s13 = scalar_lea.vmem %s198_s29, 2048  ;;  %p1333_p1 = scmp.lt.s32.totalorder %s198_s29, %s198_s29 }
  0x21   : > { %p1326_p9 = scmp.ne.s32.totalorder %s198_s29, %s1325_s13  ;;  %p1334_p4 = scmp.lt.s32.totalorder %s1325_s13, %s1325_s13 }
  0x23   : > { %p1328_p10 = pnand %p1326_p9, %p1314_p13  ;;  %p1335_p8 = por %p1334_p4, %p1333_p1 }
  0x25   : > { %p1329_p6 = pneg %p1328_p10 }
  0x27   : > { %p1336_p2 = pnand %p1335_p8, %p1329_p6 }
  0x29   : > { %1339 = shalt.err (!%p1336_p2)
}
  0x2a   : > { %s1459_s14 = smov 64   ;;  %s1460_s21 = smov 4  }
  0x2b   : > { %1204 = dma.hbm_to_vmem [thread:$0]  (!%p1555_p11), %s1784_s1, 2048, %s198_s29, [#allocation7], %s1459_s14, %s1459_s14, %s1460_s21  }
  0x2c   : > { %p42_p1 = scmp.ge.s32.totalorder %s40_s5, 2  ;;  %s49_s6 = sadd.s32 1, %s1444_s17 }
  0x2d   : > { %p56_p2 = scmp.ne.s32.totalorder %s1444_s17, %s1440_s16  ;;  %p57_p4 = scmp.eq.s32.totalorder %s1456_s20, 0 }
  0x2e   : > { %s1813_s5 = smov (%p42_p1, %s40_s5), 0  ;;  %p1799_p8 = scmp.ne.s32.totalorder %s1793_s24, 0 }
  0x2f   : > { %p1582_p6 = por %p57_p4, %p56_p2  ;;  %s44_s30 = ssub.s32 %s1452_s19, %s1813_s5 }
  0x30   : > { %p1588_p10 = por %p1799_p8, %p56_p2  ;;  %p1214_p12 = scmp.lt.s32.totalorder %s1456_s20, 2 }
  0x31   : > { %p47_p11 = scmp.eq.s32.totalorder %s44_s30, 0  ;;  %s223_s29 = sand.u32 1, %s1444_s17  }
  0x32   : > { %s984_s9 = sshll.u32 %s223_s29, 7  ;;  %s1048_s11 = sshll.u32 %s1452_s19, 11 }
  0x33   : > { %s1597_s10 = scalar_select %p47_p11, %s1444_s17, %s49_s6  }
  0x34   : > { %s1603_s14 = scalar_lea.hbm %s1783_s0, %s1048_s11  ;;  %s227_s24 = scalar_lea.vmem [#allocation3], %s984_s9 }
  0x35   : > { %s237_s21 = sshll.u32 %s227_s24, 4  ;;  %p1609_p13 = pnand %p1214_p12, %p1582_p6  ;;  %s1605_s21 = int_to_ptr.vmem [resolvable:$true] %s237_s21 }
  0x36   : > { %s1613_s28 = scalar_lea.sflag [#allocation4], %s223_s29  ;;  %s1340_s6 = scalar_lea.hbm %s1603_s14, 2048 }
  0x37   : > { %p1341_p0 = scmp.ne.s32.totalorder %s1603_s14, %s1340_s6  ;;  %p1342_p3 = pneg %p1609_p13 }
  0x38   : > { %s1345_s7 = scalar_lea.hbm %s1783_s0, 4096  ;;  %p1346_p9 = scmp.lt.u32.totalorder %s1603_s14, %s1783_s0 }
  0x39   : > { %p1343_p5 = pnand %p1342_p3, %p1341_p0  ;;  %p1347_p1 = scmp.lt.u32.totalorder %s1345_s7, %s1340_s6 }
  0x3a   : > { %p1349_p4 = scmp.lt.u32.totalorder %s1340_s6, %s1603_s14 }
  0x3b   : > { %p1344_p7 = pneg %p1343_p5  ;;  %p1348_p2 = por %p1347_p1, %p1346_p9 }
  0x3d   : > { %p1350_p6 = por %p1349_p4, %p1348_p2 }
  0x3f   : > { %p1351_p8 = pnand %p1350_p6, %p1344_p7 }
  0x41   : > { %1354 = shalt.err (!%p1351_p8)
}
  0x42   : > { %s1355_s29 = scalar_lea.vmem %s1605_s21, 2048  ;;  %s1461_s13 = smov [#allocation3]  }
  0x43   : > { %p1356_p12 = scmp.ne.s32.totalorder %s1605_s21, %s1355_s29  ;;  %s1360_s24 = sshll.u32 %s1461_s13, 4  ;;  %s1361_s24 = int_to_ptr.vmem [resolvable:$false] %s1360_s24 }
  0x44   : > { %s1362_s30 = scalar_lea.vmem %s1361_s24, 4096  ;;  %p1363_p5 = scmp.lt.s32.totalorder %s1605_s21, %s1361_s24 }
  0x45   : > { %p1358_p11 = pnand %p1356_p12, %p1342_p3  ;;  %p1364_p9 = scmp.lt.s32.totalorder %s1362_s30, %s1355_s29 }
  0x47   : > { %p1359_p0 = pneg %p1358_p11  ;;  %p1365_p1 = por %p1364_p9, %p1363_p5 }
  0x49   : > { %p1366_p2 = pnand %p1365_p1, %p1359_p0 }
  0x4b   : > { %1369 = shalt.err (!%p1366_p2)
}
  0x4c   : > { %s1462_s6 = smov 128   ;;  %s1463_s9 = smov 8  }
  0x4d   : > { %1208 = dma.hbm_to_vmem [thread:$0]  (!%p1609_p13), %s1603_s14, 2048, %s1605_s21, %s1613_s28, %s1462_s6, %s1462_s6, %s1463_s9  }
  0x4e   : > { %p1802_p3 = scmp.ne.s32.totalorder %s1796_s27, 0 }
  0x4f   : > { %s1644_s7 = sand.u32 (!%p1802_p3), 1, %s1440_s16   ;;  %p1803_p7 = scmp.ne.s32.totalorder (!%p1802_p3), %s1794_s25, 0 }
  0x50   : > { %249 = sbr.rel (%p1802_p3) target bundleno = 387 (0x183), region = 36  ;;  %s989_s11 = sshll.u32 (!%p1802_p3), %s1644_s7, 7 }
  0x51   : > { %s252_s12 = scalar_lea.sflag (!%p1802_p3), [#allocation4], %s1644_s7  ;;  %s1648_s29 = scalar_lea.vmem (!%p1802_p3), [#allocation3], %s989_s11 }
  0x57   : > { %1423 = dma.done.wait (%p1803_p7), %s252_s12, 2048  }
  0x58   : > { %1425 = vsyncadd (%p1803_p7), %s252_s12, 4294965248  ;;  %p1804_p13 = scmp.ne.s32.totalorder %s1792_s23, 0 }
  0x5a   : > { %1427 = dma.done.wait (%p1804_p13), [#allocation7], 2048  }
  0x5b   : > { %1429 = vsyncadd (%p1804_p13), [#allocation7], 4294965248  ;;  %v1272_v0 = vld [vmem:[#allocation6 + $0x40] sm:$0xff]   ;;  %v1274_v2 = vld [vmem:[#allocation6 + $0x48] sm:$0xff]   ;;  %s991_s21 = sshll.u32 %s1644_s7, 6  ;;  %s1065_s28 = sshll.u32 %s1448_s18, 10 }
  0x5c   : > { %v1273_v1 = vld [vmem:[#allocation6] sm:$0xff]   ;;  %1113 = vmatprep.subr.bf16.mxu0 %v1272_v0  ;;  %1177 = vmatprep.subr.bf16.mxu1 %v1272_v0  ;;  %v1275_v3 = vld [vmem:[#allocation6 + $0x8] sm:$0xff]   ;;  %v1276_v4 = vld [vmem:[#allocation6 + $0x50] sm:$0xff]   ;;  %s1693_s22 = scalar_lea.vmem [#allocation8], %s991_s21  ;;  %s1730_s6 = scalar_lea.hbm %s1787_s4, %s1065_s28 }
  0x5d   : > { %1114 = vmatpush3.bf16.msra.mxu0 %v1273_v1  ;;  %1185 = vmatpush3.bf16.msra.mxu1 %v1273_v1  ;;  %v1277_v5 = vld [vmem:[#allocation6 + $0x10] sm:$0xff]   ;;  %v1278_v6 = vld [vmem:[#allocation6 + $0x58] sm:$0xff]   ;;  %v1280_v8 = vld [vmem:[#allocation6 + $0x60] sm:$0xff]   ;;  %s850_s13 = sshll.u32 %s1693_s22, 4  ;;  %s836_s18 = scalar_lea.sflag [#allocation5], %s1644_s7  ;;  %s1732_s13 = int_to_ptr.vmem [resolvable:$true] %s850_s13 }
  0x5e   : > { %1115 = vmatprep.subr.bf16.mxu0 %v1274_v2  ;;  %1178 = vmatprep.subr.bf16.mxu1 %v1274_v2  ;;  %v1279_v7 = vld [vmem:[#allocation6 + $0x18] sm:$0xff]   ;;  %v1281_v9 = vld [vmem:[#allocation6 + $0x20] sm:$0xff]   ;;  %v1282_v10 = vld [vmem:[#allocation6 + $0x68] sm:$0xff]   ;;  %s1370_s9 = scalar_lea.vmem %s1732_s13, 1024  ;;  %s1464_s11 = smov [#allocation8]  }
  0x5f   : > { %v1290_v11 = vld [vmem:[%s1648_s29 + $0x4] ss:$8 sps:$4 sm:$0xff]   ;;  %v1284_v14 = vld [vmem:[#allocation6 + $0x70] sm:$0xff]   ;;  %v1286_v16 = vld [vmem:[#allocation6 + $0x78] sm:$0xff]   ;;  %p1371_p4 = scmp.ne.s32.totalorder %s1732_s13, %s1370_s9  ;;  %s1374_s12 = sshll.u32 %s1464_s11, 4  ;;  %s1375_s12 = int_to_ptr.vmem [resolvable:$false] %s1374_s12 }
  0x60   : > { %v1293_v12 = vld [vmem:[%s1648_s29 + $0x44] ss:$8 sps:$4 sm:$0xff]   ;;  %593 = vmatprep.mubr.bf16.mxu0 %v1290_v11  ;;  %v1285_v15 = vld [vmem:[#allocation6 + $0x30] sm:$0xff]   ;;  %v1287_v17 = vld [vmem:[#allocation6 + $0x38] sm:$0xff]   ;;  %p1377_p12 = scmp.lt.s32.totalorder %s1732_s13, %s1375_s12 }
  0x61   : > { %1116 = vmatpush3.bf16.msra.mxu0 %v1275_v3  ;;  %1186 = vmatpush3.bf16.msra.mxu1 %v1275_v3  ;;  %v1283_v13 = vld [vmem:[#allocation6 + $0x28] sm:$0xff]   ;;  %v1294_v20 = vld [vmem:[%s1648_s29 + $0x14] ss:$8 sps:$4 sm:$0xff]   ;;  %v1298_v22 = vld [vmem:[%s1648_s29 + $0x10] ss:$8 sps:$4 sm:$0xff]   ;;  %p1372_p6 = pnand %p1371_p4, %p1588_p10 }
  0x62   : > { %1117 = vmatprep.subr.bf16.mxu0 %v1276_v4  ;;  %1179 = vmatprep.subr.bf16.mxu1 %v1276_v4  ;;  %v1288_v18 = vld [vmem:[%s1648_s29] ss:$8 sps:$4 sm:$0xff]   ;;  %v1296_v21 = vld [vmem:[%s1648_s29 + $0x54] ss:$8 sps:$4 sm:$0xff]   ;;  %v1299_v23 = vld [vmem:[%s1648_s29 + $0x50] ss:$8 sps:$4 sm:$0xff]  }
  0x63   : > { %625 = vmatprep.mubr.bf16.mxu1 %v1293_v12  ;;  %v1291_v19 = vld [vmem:[%s1648_s29 + $0x40] ss:$8 sps:$4 sm:$0xff]   ;;  %v1300_v24 = vld [vmem:[%s1648_s29 + $0x24] ss:$8 sps:$4 sm:$0xff]   ;;  %v1306_v28 = vld [vmem:[%s1648_s29 + $0x34] ss:$8 sps:$4 sm:$0xff]   ;;  %p1373_p8 = pneg %p1372_p6 }
  0x64   : > { %v1302_v25 = vld [vmem:[%s1648_s29 + $0x64] ss:$8 sps:$4 sm:$0xff]   ;;  %v1304_v26 = vld [vmem:[%s1648_s29 + $0x20] ss:$8 sps:$4 sm:$0xff]   ;;  %v1308_v29 = vld [vmem:[%s1648_s29 + $0x74] ss:$8 sps:$4 sm:$0xff]  }
  0x65   : > { %1118 = vmatpush3.bf16.msra.mxu0 %v1277_v5  ;;  %1187 = vmatpush3.bf16.msra.mxu1 %v1277_v5  ;;  %v1305_v27 = vld [vmem:[%s1648_s29 + $0x60] ss:$8 sps:$4 sm:$0xff]   ;;  %v1310_v30 = vld [vmem:[%s1648_s29 + $0x30] ss:$8 sps:$4 sm:$0xff]  }
  0x66   : > { %1119 = vmatprep.subr.bf16.mxu0 %v1278_v6  ;;  %1180 = vmatprep.subr.bf16.mxu1 %v1278_v6  ;;  %v1311_v31 = vld [vmem:[%s1648_s29 + $0x70] ss:$8 sps:$4 sm:$0xff]   ;;  %v1677_v35 = vld [vmem:[%s1785_s2] ss:$0 sm:$0xff]  ;;  %s1376_s29 = scalar_lea.vmem %s1375_s12, 2048 }
  0x67   : > { %v1684_v47 = vld [vmem:[%s1786_s3] ss:$0 sm:$0xff]  ;;  %p1378_p11 = scmp.lt.s32.totalorder %s1376_s29, %s1370_s9 }
  0x69   : > { %1120 = vmatpush3.bf16.msra.mxu0 %v1279_v7  ;;  %1188 = vmatpush3.bf16.msra.mxu1 %v1279_v7  ;;  %p1379_p0 = por %p1378_p11, %p1377_p12 }
  0x6a   : > { %1121 = vmatprep.subr.bf16.mxu0 %v1280_v8  ;;  %1181 = vmatprep.subr.bf16.mxu1 %v1280_v8 }
  0x6b   : > { %p1380_p5 = pnand %p1379_p0, %p1373_p8 }
  0x6d   : > { %1122 = vmatpush3.bf16.msra.mxu0 %v1281_v9  ;;  %1189 = vmatpush3.bf16.msra.mxu1 %v1281_v9 }
  0x6e   : > { %1123 = vmatprep.subr.bf16.mxu0 %v1282_v10  ;;  %1182 = vmatprep.subr.bf16.mxu1 %v1282_v10 }
  0x71   : > { %1124 = vmatpush3.bf16.msra.mxu0 %v1283_v13  ;;  %1190 = vmatpush3.bf16.msra.mxu1 %v1283_v13 }
  0x72   : > { %1125 = vmatprep.subr.bf16.mxu0 %v1284_v14  ;;  %1183 = vmatprep.subr.bf16.mxu1 %v1284_v14 }
  0x75   : > { %1126 = vmatpush3.bf16.msra.mxu0 %v1285_v15  ;;  %1191 = vmatpush3.bf16.msra.mxu1 %v1285_v15 }
  0x76   : > { %1127 = vmatprep.subr.bf16.mxu0 %v1286_v16  ;;  %1184 = vmatprep.subr.bf16.mxu1 %v1286_v16 }
  0x79   : > { %1128 = vmatpush3.bf16.msra.mxu0 %v1287_v17  ;;  %1192 = vmatpush3.bf16.msra.mxu1 %v1287_v17 }
  0x7c   : > { %594 = vmatmul.mubr.bf16.vlgmr.msra.gmra.mrb[0].mxu0 %v1288_v18  ;;  %626 = vmatmul.mubr.bf16.vlgmr.msra.gmra.mrb[0].mxu1 %v1291_v19 }
  0x7d   : > { %601 = vmatprep.mubr.bf16.mxu0 %v1294_v20  ;;  %633 = vmatprep.mubr.bf16.mxu1 %v1296_v21 }
  0x84   : > { %602 = vmatmul.mubr.bf16.gmra.mrb[4].mxu0 %v1298_v22  ;;  %634 = vmatmul.mubr.bf16.gmra.mrb[4].mxu1 %v1299_v23 }
  0x85   : > { %609 = vmatprep.mubr.bf16.mxu0 %v1300_v24  ;;  %641 = vmatprep.mubr.bf16.mxu1 %v1302_v25 }
  0x8c   : > { %610 = vmatmul.mubr.bf16.gmra.mrb[8].mxu0 %v1304_v26  ;;  %642 = vmatmul.mubr.bf16.gmra.mrb[8].mxu1 %v1305_v27 }
  0x8d   : > { %617 = vmatprep.mubr.bf16.mxu0 %v1306_v28  ;;  %649 = vmatprep.mubr.bf16.mxu1 %v1308_v29 }
  0x94   : > { %618 = vmatmul.mubr.bf16.gmra.mrb[12].mxu0 %v1310_v30  ;;  %650 = vmatmul.mubr.bf16.gmra.mrb[12].mxu1 %v1311_v31 }
 0x14f   : > { %v1129_v32 = vpop.f32.mrb[0].mxu0  ;;  %v1153_v33 = vpop.f32.mrb[0].mxu1 }
 0x150   : > { %v1130_v34 = vpop.f32.mrb[1].mxu0  ;;  %v1154_v36 = vpop.f32.mrb[1].mxu1 }
 0x151   : > { %v1131_v37 = vadd.f32 %v1130_v34, %v1129_v32  ;;  %v1155_v38 = vadd.f32 %v1154_v36, %v1153_v33  ;;  %v1132_v39 = vpop.f32.mrb[2].mxu0  ;;  %v1156_v40 = vpop.f32.mrb[2].mxu1 }
 0x152   : > { %v1133_v41 = vpop.f32.mrb[3].mxu0  ;;  %v1157_v42 = vpop.f32.mrb[3].mxu1 }
 0x153   : > { %v716_v43 = vmul.f32 %v1131_v37, %v1677_v35  ;;  %v724_v44 = vmul.f32 %v1155_v38, %v1677_v35  ;;  %v1134_v45 = vadd.f32 %v1133_v41, %v1132_v39  ;;  %v1158_v46 = vadd.f32 %v1157_v42, %v1156_v40 }
 0x155   : > { %v717_v48 = vmul.f32 %v1134_v45, %v1677_v35  ;;  %v725_v49 = vmul.f32 %v1158_v46, %v1677_v35  ;;  %v739_v50 = vadd.f32 %v1684_v47, %v716_v43  ;;  %v747_v51 = vadd.f32 %v1684_v47, %v724_v44 }
 0x157   : > { %v740_v52 = vadd.f32 %v1684_v47, %v717_v48  ;;  %v748_v53 = vadd.f32 %v1684_v47, %v725_v49  ;;  %v1135_v54 = vpop.f32.mrb[4].mxu0  ;;  %v1159_v55 = vpop.f32.mrb[4].mxu1 }
 0x158   : > { %v1136_v56 = vpop.f32.mrb[5].mxu0  ;;  %v1160_v57 = vpop.f32.mrb[5].mxu1 }
 0x159   : > { %v1069_v58 = vpack.c.bf16 %v740_v52, %v739_v50  ;;  %v1089_v59 = vpack.c.bf16 %v748_v53, %v747_v51  ;;  %v1137_v60 = vadd.f32 %v1136_v56, %v1135_v54  ;;  %v1161_v61 = vadd.f32 %v1160_v57, %v1159_v55  ;;  %v1138_v62 = vpop.f32.mrb[6].mxu0  ;;  %v1162_v63 = vpop.f32.mrb[6].mxu1 }
 0x15a   : > { %v1139_v0 = vpop.f32.mrb[7].mxu0  ;;  %v1163_v1 = vpop.f32.mrb[7].mxu1 }
 0x15b   : > { %1070 = vst [vmem:[%s1693_s22] sm:$0xff] %v1069_v58   ;;  %1109 = vst [vmem:[%s1693_s22 + $0x20] sm:$0xff] %v1089_v59   ;;  %v718_v2 = vmul.f32 %v1137_v60, %v1677_v35  ;;  %v726_v3 = vmul.f32 %v1161_v61, %v1677_v35  ;;  %v1140_v4 = vadd.f32 %v1139_v0, %v1138_v62 }
 0x15c   : > { %v1164_v5 = vadd.f32 %v1163_v1, %v1162_v63 }
 0x15d   : > { %v719_v6 = vmul.f32 %v1140_v4, %v1677_v35  ;;  %v741_v8 = vadd.f32 %v1684_v47, %v718_v2  ;;  %v749_v9 = vadd.f32 %v1684_v47, %v726_v3 }
 0x15e   : > { %v727_v7 = vmul.f32 %v1164_v5, %v1677_v35 }
 0x15f   : > { %v742_v10 = vadd.f32 %v1684_v47, %v719_v6  ;;  %v1141_v12 = vpop.f32.mrb[8].mxu0  ;;  %v1165_v13 = vpop.f32.mrb[8].mxu1 }
 0x160   : > { %v750_v11 = vadd.f32 %v1684_v47, %v727_v7  ;;  %v1142_v14 = vpop.f32.mrb[9].mxu0  ;;  %v1166_v15 = vpop.f32.mrb[9].mxu1 }
 0x161   : > { %v1074_v16 = vpack.c.bf16 %v742_v10, %v741_v8  ;;  %v1143_v18 = vadd.f32 %v1142_v14, %v1141_v12  ;;  %v1167_v19 = vadd.f32 %v1166_v15, %v1165_v13  ;;  %v1144_v20 = vpop.f32.mrb[10].mxu0  ;;  %v1168_v21 = vpop.f32.mrb[10].mxu1 }
 0x162   : > { %v1094_v17 = vpack.c.bf16 %v750_v11, %v749_v9  ;;  %v1145_v22 = vpop.f32.mrb[11].mxu0  ;;  %v1169_v23 = vpop.f32.mrb[11].mxu1 }
 0x163   : > { %1106 = vst [vmem:[%s1693_s22 + $0x8] sm:$0xff] %v1074_v16   ;;  %v720_v24 = vmul.f32 %v1143_v18, %v1677_v35  ;;  %v728_v25 = vmul.f32 %v1167_v19, %v1677_v35  ;;  %v1146_v26 = vadd.f32 %v1145_v22, %v1144_v20  ;;  %v1170_v27 = vadd.f32 %v1169_v23, %v1168_v21 }
 0x164   : > { %1110 = vst [vmem:[%s1693_s22 + $0x28] sm:$0xff] %v1094_v17  }
 0x165   : > { %v721_v28 = vmul.f32 %v1146_v26, %v1677_v35  ;;  %v729_v29 = vmul.f32 %v1170_v27, %v1677_v35  ;;  %v743_v30 = vadd.f32 %v1684_v47, %v720_v24  ;;  %v751_v31 = vadd.f32 %v1684_v47, %v728_v25 }
 0x167   : > { %v744_v32 = vadd.f32 %v1684_v47, %v721_v28  ;;  %v752_v33 = vadd.f32 %v1684_v47, %v729_v29  ;;  %v1147_v34 = vpop.f32.mrb[12].mxu0  ;;  %v1171_v36 = vpop.f32.mrb[12].mxu1 }
 0x168   : > { %v1148_v37 = vpop.f32.mrb[13].mxu0  ;;  %v1172_v38 = vpop.f32.mrb[13].mxu1 }
 0x169   : > { %v1079_v39 = vpack.c.bf16 %v744_v32, %v743_v30  ;;  %v1099_v40 = vpack.c.bf16 %v752_v33, %v751_v31  ;;  %v1149_v41 = vadd.f32 %v1148_v37, %v1147_v34  ;;  %v1173_v42 = vadd.f32 %v1172_v38, %v1171_v36  ;;  %v1150_v43 = vpop.f32.mrb[14].mxu0  ;;  %v1174_v44 = vpop.f32.mrb[14].mxu1 }
 0x16a   : > { %v1151_v45 = vpop.f32.mrb[15].mxu0  ;;  %v1175_v46 = vpop.f32.mrb[15].mxu1 }
 0x16b   : > { %1107 = vst [vmem:[%s1693_s22 + $0x10] sm:$0xff] %v1079_v39   ;;  %1111 = vst [vmem:[%s1693_s22 + $0x30] sm:$0xff] %v1099_v40   ;;  %v722_v48 = vmul.f32 %v1149_v41, %v1677_v35  ;;  %v730_v49 = vmul.f32 %v1173_v42, %v1677_v35  ;;  %v1152_v50 = vadd.f32 %v1151_v45, %v1150_v43 }
 0x16c   : > { %v1176_v51 = vadd.f32 %v1175_v46, %v1174_v44 }
 0x16d   : > { %v723_v52 = vmul.f32 %v1152_v50, %v1677_v35  ;;  %v745_v54 = vadd.f32 %v1684_v47, %v722_v48  ;;  %v753_v55 = vadd.f32 %v1684_v47, %v730_v49 }
 0x16e   : > { %v731_v53 = vmul.f32 %v1176_v51, %v1677_v35 }
 0x16f   : > { %v746_v56 = vadd.f32 %v1684_v47, %v723_v52 }
 0x170   : > { %v754_v57 = vadd.f32 %v1684_v47, %v731_v53 }
 0x171   : > { %v1084_v35 = vpack.c.bf16 %v746_v56, %v745_v54 }
 0x172   : > { %v1104_v58 = vpack.c.bf16 %v754_v57, %v753_v55 }
 0x173   : > { %1108 = vst [vmem:[%s1693_s22 + $0x18] sm:$0xff] %v1084_v35  }
 0x174   : > { %1112 = vst [vmem:[%s1693_s22 + $0x38] sm:$0xff] %v1104_v58  }
 0x175   : > { %1383 = shalt.err (!%p1380_p5)
}
 0x176   : > { %s1384_s23 = scalar_lea.hbm %s1730_s6, 1024  ;;  %s1388_s14 = scalar_lea.hbm %s1787_s4, 2048 }
 0x177   : > { %p1385_p9 = scmp.ne.s32.totalorder %s1730_s6, %s1384_s23  ;;  %p1389_p3 = scmp.lt.u32.totalorder %s1730_s6, %s1787_s4 }
 0x178   : > { %p1390_p7 = scmp.lt.u32.totalorder %s1388_s14, %s1384_s23  ;;  %p1392_p4 = scmp.lt.u32.totalorder %s1384_s23, %s1730_s6 }
 0x179   : > { %p1386_p1 = pnand %p1385_p9, %p1588_p10 }
 0x17a   : > { %p1391_p13 = por %p1390_p7, %p1389_p3 }
 0x17b   : > { %p1387_p2 = pneg %p1386_p1 }
 0x17c   : > { %p1393_p6 = por %p1392_p4, %p1391_p13 }
 0x17e   : > { %p1394_p8 = pnand %p1393_p6, %p1387_p2 }
 0x180   : > { %1397 = shalt.err (!%p1394_p8)
}
 0x181   : > { %s1465_s28 = smov 64   ;;  %s1466_s24 = smov 4  }
 0x182   : > { %1199 = dma.vmem_to_hbm [thread:$0]  (%p1588_p10), %s1732_s13, 1024, %s1730_s6, %s836_s18, %s1465_s28, %s1465_s28, %s1466_s24  }
 0x183 PF: > { %s865_s30 = sand.u32 1, %s1436_s15   ;;  %p1805_p12 = scmp.ne.s32.totalorder %s1795_s26, 0 }
 0x184   : > { %p1806_p11 = scmp.ge.s32.totalorder %s1456_s20, 2  ;;  %s866_s9 = scalar_lea.sflag [#allocation5], %s865_s30 }
 0x186   : > { %p1210_p0 = pnand %p1806_p11, %p1805_p12 }
 0x188   : > { %1431 = dma.done.wait (!%p1210_p0), %s866_s9, 1024  }
 0x189   : > { %1433 = vsyncadd (!%p1210_p0), %s866_s9, 4294966272  ;;  %s21_s20 = sadd.s32 1, %s1456_s20   ;;  %s1807_s15 = smov %s1440_s16 }
 0x18a   : > { %p18_p5 = scmp.ge.s32.totalorder %s21_s20, 4   ;;  %s1808_s16 = smov %s1444_s17 }
 0x18b   : > { %s1809_s17 = smov %s1597_s10  ;;  %s1810_s18 = smov %s1452_s19 }
 0x18c   : > { %s1811_s19 = smov %s1813_s5  ;;  %20 = sbr.rel (!%p18_p5) target bundleno = 7 (0x7), region = 100 }
 0x193   :  { %871 = vsyncpa [#allocation4], 1 }
 0x194   :  { %873 = vsyncpa [#allocation4 + $0x1], 1 }
 0x195   :  { %874 = vsyncpa [#allocation7], 1 }
 0x196   :  { %875 = vsyncpa [#allocation5], 1 }
 0x197   :  { %877 = vsyncpa [#allocation5 + $0x1], 1 }

</bundles_post_ra>
